<compile_context>
chip_gen: v7x
topology: tpu7x:2x2x1
jax: 0.10.0
libtpu: 0.0.40
codegen_flags: <defaults>
</compile_context>

<pallas_src>
import jax
import jax.numpy as jnp
from jax.experimental import pallas as pl
from jax.experimental.pallas import tpu as pltpu


def _net1_relu_kernel(xt_ref, w0t_ref, b0_ref, w1_ref, b1_ref, ot_ref):
    # xt_ref : (2, TB)   batch on lanes
    # w0t_ref: (H, 2)    w0t[:, k] = w0[k, :]
    # b0_ref : (H, 1)
    # w1_ref : (H, 2)
    # b1_ref : (1, 2)
    # ot_ref : (2, TB)   row 0 = P(class 0), row 1 = P(class 1)
    x0 = xt_ref[0:1, :].astype(jnp.float32)          # (1, TB)
    x1 = xt_ref[1:2, :].astype(jnp.float32)          # (1, TB)

    w00 = w0t_ref[:, 0:1].astype(jnp.float32)        # (H, 1)  weights from input feature 0
    w01 = w0t_ref[:, 1:2].astype(jnp.float32)        # (H, 1)  weights from input feature 1
    b0 = b0_ref[...].astype(jnp.float32)              # (H, 1)

    # Hidden layer: pure-VPU outer-product FMAs + ReLU (no MXU for K=2).
    h = jnp.maximum(w00 * x0 + w01 * x1 + b0, 0.0)    # (H, TB)

    # Output layer + 2-class softmax via sigmoid-of-difference:
    #   d = l0 - l1 = (w1[:,0]-w1[:,1]) . h + (b1[0]-b1[1])
    wdiff = (w1_ref[:, 0:1] - w1_ref[:, 1:2]).astype(jnp.float32)   # (H, 1)
    bdiff = (b1_ref[0:1, 0:1] - b1_ref[0:1, 1:2]).astype(jnp.float32)  # (1, 1)

    d = jnp.sum(wdiff * h, axis=0, keepdims=True) + bdiff            # (1, TB)
    p0 = 1.0 / (1.0 + jnp.exp(-d))                                    # sigmoid, stable (inf -> 0)

    ot_ref[0:1, :] = p0.astype(ot_ref.dtype)
    ot_ref[1:2, :] = (1.0 - p0).astype(ot_ref.dtype)


def _round_up(n, m):
    return ((n + m - 1) // m) * m


def network1_relu_forward(x, w0, b0, w1, b1, *, tb=512):
    """x: (B, 2) f32 -> (B, 2) f32 softmax probabilities."""
    B, IN = x.shape
    H = w0.shape[1]
    OUT = w1.shape[1]
    assert IN == 2 and OUT == 2, "Network1_Relu has 2 inputs and 2 outputs"

    # Lane-dense, transposed layout: batch on the last (lane) axis.
    xt = x.T                                    # (2, B)

    # Tile the batch axis. Keep the tile a multiple of 128 lanes and modest in
    # VMEM so the same tiling is safe on v7x (64 MiB physical / 32 MiB scoped).
    tb = max(128, min(_round_up(tb, 128), 4096))
    tb = min(tb, _round_up(B, 128))
    Bp = _round_up(B, tb)
    if Bp != B:
        xt = jnp.pad(xt, ((0, 0), (0, Bp - B)))  # padded columns are sliced off below

    w0t = w0.T                                   # (H, 2)
    b0c = b0.reshape(H, 1)
    b1r = b1.reshape(1, OUT)

    grid = (Bp // tb,)

    # Advisory cost hint so XLA schedules around the custom call sensibly.
    cost = pl.CostEstimate(
        flops=int(Bp * (6 * H + 8)),
        transcendentals=int(Bp),
        bytes_accessed=int(4 * (IN * Bp + OUT * Bp + w0t.size + H + w1.size + OUT)),
    )

    ot = pl.pallas_call(
        _net1_relu_kernel,
        out_shape=jax.ShapeDtypeStruct((OUT, Bp), x.dtype),
        grid=grid,
        in_specs=[
            pl.BlockSpec((IN, tb), lambda i: (0, i)),    # xt tile, lane-dense
            pl.BlockSpec((H, IN), lambda i: (0, 0)),     # w0t (resident)
            pl.BlockSpec((H, 1), lambda i: (0, 0)),      # b0
            pl.BlockSpec((H, OUT), lambda i: (0, 0)),    # w1
            pl.BlockSpec((1, OUT), lambda i: (0, 0)),    # b1
        ],
        out_specs=pl.BlockSpec((OUT, tb), lambda i: (0, i)),
        compiler_params=pltpu.CompilerParams(
            dimension_semantics=("parallel",),           # batch tiles split across TCs (v7x)
        ),
        cost_estimate=cost,
    )(xt, w0t, b0c, w1, b1r)

    # Back to the PyTorch (B, 2) layout; drop batch padding.
    return ot[:, :B].T


if __name__ == "__main__":
    key = jax.random.PRNGKey(0)
    kx, k0w, k0b, k1w, k1b = jax.random.split(key, 5)

    batch = 1024        # small, but enough to exercise lane-dense batch tiling
    hidden = 32

    x = jax.random.normal(kx, (batch, 2), dtype=jnp.float32)
    w0 = jax.random.normal(k0w, (2, hidden), dtype=jnp.float32) * 0.5
    b0 = jax.random.normal(k0b, (hidden,), dtype=jnp.float32) * 0.1
    w1 = jax.random.normal(k1w, (hidden, 2), dtype=jnp.float32) * 0.5
    b1 = jax.random.normal(k1b, (2,), dtype=jnp.float32) * 0.1

    out = network1_relu_forward(x, w0, b0, w1, b1)
    out = jax.block_until_ready(out)

    # Pure-JAX reference of the PyTorch forward.
    hidden_act = jnp.maximum(x @ w0 + b0, 0.0)
    ref = jax.nn.softmax(hidden_act @ w1 + b1, axis=-1)

    assert out.shape == (batch, 2)
    assert jnp.allclose(out, ref, atol=1e-5), "mismatch vs reference"
    assert jnp.allclose(jnp.sum(out, axis=-1), 1.0, atol=1e-5)

    print("KERNEL_OK")
</pallas_src>

<mosaic_0001>
module attributes {stable_mosaic.version = 11 : i64} {
  func.func @_net1_relu_kernel(%arg0: i32, %arg1: memref<2x512xf32, #tpu.memory_space<vmem>>, %arg2: memref<32x2xf32, #tpu.memory_space<vmem>>, %arg3: memref<32x1xf32, #tpu.memory_space<vmem>>, %arg4: memref<32x2xf32, #tpu.memory_space<vmem>>, %arg5: memref<1x2xf32, #tpu.memory_space<vmem>>, %arg6: memref<2x512xf32, #tpu.memory_space<vmem>>) attributes {dimension_semantics = [#tpu.dimension_semantics<parallel>], iteration_bounds = array<i64: 2>, scalar_prefetch = 0 : i64, scratch_operands = 0 : i64, tpu.core_type = #tpu.core_type<tc>, window_params = [{transform_indices = @transform_0, window_bounds = array<i64: 2, 512>}, {pipeline_mode = #tpu.pipeline_mode<synchronous>, transform_indices = @transform_1, window_bounds = array<i64: 32, 2>}, {pipeline_mode = #tpu.pipeline_mode<synchronous>, transform_indices = @transform_2, window_bounds = array<i64: 32, 1>}, {pipeline_mode = #tpu.pipeline_mode<synchronous>, transform_indices = @transform_3, window_bounds = array<i64: 32, 2>}, {pipeline_mode = #tpu.pipeline_mode<synchronous>, transform_indices = @transform_4, window_bounds = array<i64: 1, 2>}, {transform_indices = @transform_5, window_bounds = array<i64: 2, 512>}]} {
    %c0 = arith.constant 0 : index
    %c0_0 = arith.constant 0 : index
    %0 = vector.load %arg1[%c0, %c0_0] : memref<2x512xf32, #tpu.memory_space<vmem>>, vector<1x512xf32>
    %c1 = arith.constant 1 : index
    %c0_1 = arith.constant 0 : index
    %1 = vector.load %arg1[%c1, %c0_1] : memref<2x512xf32, #tpu.memory_space<vmem>>, vector<1x512xf32>
    %c0_2 = arith.constant 0 : index
    %c0_3 = arith.constant 0 : index
    %2 = vector.load %arg2[%c0_2, %c0_3] : memref<32x2xf32, #tpu.memory_space<vmem>>, vector<32x1xf32>
    %c0_4 = arith.constant 0 : index
    %c1_5 = arith.constant 1 : index
    %3 = vector.load %arg2[%c0_4, %c1_5] : memref<32x2xf32, #tpu.memory_space<vmem>>, vector<32x1xf32>
    %c0_6 = arith.constant 0 : index
    %c0_7 = arith.constant 0 : index
    %4 = vector.load %arg3[%c0_6, %c0_7] : memref<32x1xf32, #tpu.memory_space<vmem>>, vector<32x1xf32>
    %5 = vector.broadcast %2 : vector<32x1xf32> to vector<32x512xf32>
    %6 = vector.broadcast %0 : vector<1x512xf32> to vector<32x512xf32>
    %7 = arith.mulf %5, %6 : vector<32x512xf32>
    %8 = vector.broadcast %3 : vector<32x1xf32> to vector<32x512xf32>
    %9 = vector.broadcast %1 : vector<1x512xf32> to vector<32x512xf32>
    %10 = arith.mulf %8, %9 : vector<32x512xf32>
    %11 = arith.addf %7, %10 : vector<32x512xf32>
    %12 = vector.broadcast %4 : vector<32x1xf32> to vector<32x512xf32>
    %13 = arith.addf %11, %12 : vector<32x512xf32>
    %cst = arith.constant 0.000000e+00 : f32
    %14 = vector.broadcast %cst : f32 to vector<32x512xf32>
    %15 = arith.maximumf %13, %14 : vector<32x512xf32>
    %c0_8 = arith.constant 0 : index
    %c0_9 = arith.constant 0 : index
    %16 = vector.load %arg4[%c0_8, %c0_9] : memref<32x2xf32, #tpu.memory_space<vmem>>, vector<32x1xf32>
    %c0_10 = arith.constant 0 : index
    %c1_11 = arith.constant 1 : index
    %17 = vector.load %arg4[%c0_10, %c1_11] : memref<32x2xf32, #tpu.memory_space<vmem>>, vector<32x1xf32>
    %18 = arith.subf %16, %17 : vector<32x1xf32>
    %c0_12 = arith.constant 0 : index
    %c0_13 = arith.constant 0 : index
    %19 = vector.load %arg5[%c0_12, %c0_13] : memref<1x2xf32, #tpu.memory_space<vmem>>, vector<1x1xf32>
    %c0_14 = arith.constant 0 : index
    %c1_15 = arith.constant 1 : index
    %20 = vector.load %arg5[%c0_14, %c1_15] : memref<1x2xf32, #tpu.memory_space<vmem>>, vector<1x1xf32>
    %21 = arith.subf %19, %20 : vector<1x1xf32>
    %22 = vector.broadcast %18 : vector<32x1xf32> to vector<32x512xf32>
    %23 = arith.mulf %22, %15 : vector<32x512xf32>
    %cst_16 = arith.constant dense<0.000000e+00> : vector<512xf32>
    %24 = vector.multi_reduction <add>, %23, %cst_16 [0] : vector<32x512xf32> to vector<512xf32>
    %25 = vector.shape_cast %24 : vector<512xf32> to vector<1x512xf32>
    %26 = vector.broadcast %21 : vector<1x1xf32> to vector<1x512xf32>
    %27 = arith.addf %25, %26 : vector<1x512xf32>
    %cst_17 = arith.constant 0.000000e+00 : f32
    %28 = vector.broadcast %cst_17 : f32 to vector<1x512xf32>
    %29 = arith.subf %28, %27 : vector<1x512xf32>
    %30 = math.exp %29 : vector<1x512xf32>
    %cst_18 = arith.constant 1.000000e+00 : f32
    %31 = vector.broadcast %cst_18 : f32 to vector<1x512xf32>
    %32 = arith.addf %31, %30 : vector<1x512xf32>
    %cst_19 = arith.constant 1.000000e+00 : f32
    %33 = vector.broadcast %cst_19 : f32 to vector<1x512xf32>
    %34 = arith.divf %33, %32 : vector<1x512xf32>
    %c0_20 = arith.constant 0 : index
    %c0_21 = arith.constant 0 : index
    %35 = vector.load %arg6[%c0_20, %c0_21] : memref<2x512xf32, #tpu.memory_space<vmem>>, vector<1x512xf32>
    tpu.vector_store %arg6[%c0_20, %c0_21], %34 {strides = array<i32>} : memref<2x512xf32, #tpu.memory_space<vmem>>, vector<1x512xf32>,
    %cst_22 = arith.constant 1.000000e+00 : f32
    %36 = vector.broadcast %cst_22 : f32 to vector<1x512xf32>
    %37 = arith.subf %36, %34 : vector<1x512xf32>
    %c1_23 = arith.constant 1 : index
    %c0_24 = arith.constant 0 : index
    %38 = vector.load %arg6[%c1_23, %c0_24] : memref<2x512xf32, #tpu.memory_space<vmem>>, vector<1x512xf32>
    tpu.vector_store %arg6[%c1_23, %c0_24], %37 {strides = array<i32>} : memref<2x512xf32, #tpu.memory_space<vmem>>, vector<1x512xf32>,
    return
  }
  func.func @transform_0(%arg0: i32) -> (i32, i32) {
    %c0_i32 = arith.constant 0 : i32
    %c0_i32_0 = arith.constant 0 : i32
    return %c0_i32, %arg0 : i32, i32
  }
  func.func @transform_1(%arg0: i32) -> (i32, i32) {
    %c0_i32 = arith.constant 0 : i32
    %c0_i32_0 = arith.constant 0 : i32
    %c0_i32_1 = arith.constant 0 : i32
    return %c0_i32, %c0_i32_0 : i32, i32
  }
  func.func @transform_2(%arg0: i32) -> (i32, i32) {
    %c0_i32 = arith.constant 0 : i32
    %c0_i32_0 = arith.constant 0 : i32
    %c0_i32_1 = arith.constant 0 : i32
    return %c0_i32, %c0_i32_0 : i32, i32
  }
  func.func @transform_3(%arg0: i32) -> (i32, i32) {
    %c0_i32 = arith.constant 0 : i32
    %c0_i32_0 = arith.constant 0 : i32
    %c0_i32_1 = arith.constant 0 : i32
    return %c0_i32, %c0_i32_0 : i32, i32
  }
  func.func @transform_4(%arg0: i32) -> (i32, i32) {
    %c0_i32 = arith.constant 0 : i32
    %c0_i32_0 = arith.constant 0 : i32
    %c0_i32_1 = arith.constant 0 : i32
    return %c0_i32, %c0_i32_0 : i32, i32
  }
  func.func @transform_5(%arg0: i32) -> (i32, i32) {
    %c0_i32 = arith.constant 0 : i32
    %c0_i32_0 = arith.constant 0 : i32
    return %c0_i32, %arg0 : i32, i32
  }
}

</mosaic_0001>

<bundles_post_ra>
// kernel: tpu_custom_call.1
= control target key start
LH: loop header
LB: loop body
LE: loop exit
PB: predicated region body
PF: predicated region fallthrough
CT: control target
= control target key end

     0   :  { %10 = vsyncpa [#allocation3], 0  ;;  %s1030_s0 = inlined_call_operand.vmem [shape: f32[2,1024], index: 0, kind: input, shape index: {}]   ;;  %s1031_s1 = inlined_call_operand.vmem [shape: f32[32,2], index: 1, kind: input, shape index: {}]   ;;  %s1032_s2 = inlined_call_operand.vmem [shape: f32[32,1], index: 2, kind: input, shape index: {}]   ;;  %s1033_s3 = inlined_call_operand.vmem [shape: f32[32,2], index: 3, kind: input, shape index: {}]   ;;  %s1034_s4 = inlined_call_operand.vmem [shape: f32[1,2], index: 4, kind: input, shape index: {}]   ;;  %s1035_s5 = inlined_call_operand.hbm [shape: f32[2,1024], index: 5, kind: output, shape index: {}]  }
   0x1   :  { %12 = vsyncpa [#allocation3 + $0x1], 0  ;;  %s874_s18 = smov 0   ;;  %s876_s19 = smov 0  }
   0x2   :  { %s878_s20 = smov 0   ;;  %s880_s21 = smov 0  }
   0x3 LB: > { %s895_s22 = sadd.s32 4294967295, %s837_s21   ;;  %s697_s23 = sadd.s32 4294967294, %s837_s21   ;;  %s837_s21 = sphi %s880_s21, %s1041_s21   ;;  %s833_s20 = sphi %s878_s20, %s1040_s20   ;;  %s829_s19 = sphi %s876_s19, %s1039_s19   ;;  %s825_s18 = sphi %s874_s18, %s1038_s18  }
   0x4   : > { %s899_s24 = sadd.s32 1, %s837_s21   ;;  %s135_s25 = sadd.s32 1, %s833_s20 }
   0x5   : > { %s132_s26 = ssub.s32 %s837_s21, %s899_s24  ;;  %p145_p0 = scmp.ne.s32.totalorder %s833_s20, %s829_s19 }
   0x6   : > { %p133_p1 = scmp.eq.s32.totalorder %s132_s26, 0  ;;  %p146_p2 = scmp.eq.s32.totalorder %s895_s22, 1 }
   0x7   : > { %p151_p3 = scmp.ne.s32.totalorder %s829_s19, %s825_s18  ;;  %p152_p4 = scmp.eq.s32.totalorder %s697_s23, 1 }
   0x8   : > { %s910_s27 = scalar_select %p133_p1, %s833_s20, %s135_s25  }
   0x9   : > { %p912_p5 = por %p146_p2, %p145_p0  ;;  %p916_p6 = por %p152_p4, %p151_p3 }
   0xa   : > { %p700_p7 = scmp.ge.s32.totalorder %s837_s21, 1  ;;  %p191_p8 = scmp.lt.s32.totalorder %s837_s21, 3 }
   0xc   : > { %p192_p9 = pnand %p700_p7, %p191_p8 }
   0xd   : > { %v415_v0 = vld [vmem:[%s1033_s3] sm:$0xff] (!%p192_p9)  ;;  %v417_v1 = vld [vmem:[%s1033_s3 + $0x10] sm:$0xff] (!%p192_p9)  ;;  %s839_s9 = smov (!%p192_p9), 127   ;;  %v416_v2 = vld [vmem:[%s1033_s3 + $0x8] sm:$0xff] (!%p192_p9)  ;;  %v840_v4 = vmov (!%p192_p9), 0   ;;  %v841_v8 = vmov (!%p192_p9), 1   ;;  %v258_v27 = vlaneseq (!%p192_p9) }
   0xe   : > { %195 = sbr.rel (%p192_p9) target bundleno = 341 (0x155), region = 40  ;;  %423 = vrot.lane.b32.xlu0 (!%p192_p9), %v415_v0, %s839_s9  ;;  %427 = vrot.lane.b32.xlu1 (!%p192_p9), %v417_v1, %s839_s9  ;;  %v418_v3 = vld [vmem:[%s1033_s3 + $0x18] sm:$0xff] (!%p192_p9)  ;;  %v439_v5 = vld [vmem:[%s1034_s4] sm:$0x1] (!%p192_p9)  ;;  %s702_s16 = sshll.u32 (!%p192_p9), %s895_s22, 2 }
   0xf   : > { %755 = vset.pattern.permute.xlu1 (!%p192_p9), %v840_v4  ;;  %756 = vset.pattern.permute.xlu0 (!%p192_p9), %v840_v4  ;;  %v229_v6 = vld [vmem:[%s1031_s1] sm:$0xff] (!%p192_p9)  ;;  %v230_v7 = vld [vmem:[%s1031_s1 + $0x8] sm:$0xff] (!%p192_p9)  ;;  %v231_v9 = vld [vmem:[%s1031_s1 + $0x10] sm:$0xff] (!%p192_p9)  ;;  %p220_p10 = scmp.lt.s32.totalorder (!%p192_p9), %s702_s16, 7  ;;  %v963_v29 = vshrl.u32 (!%p192_p9), %v258_v27, 7  ;;  %s216_s30 = sand.u32 (!%p192_p9), 1, %s829_s19  }
  0x10   : > { %v232_v10 = vld [vmem:[%s1031_s1 + $0x18] sm:$0xff] (!%p192_p9)  ;;  %v233_v11 = vld [vmem:[%s1032_s2] sm:$0xff] (!%p192_p9)  ;;  %v235_v12 = vld [vmem:[%s1032_s2 + $0x10] sm:$0xff] (!%p192_p9)  ;;  %s701_s6 = sshll.u32 (!%p192_p9), %s216_s30, 3  ;;  %vm585_vm0 = vcmp.lt.s32.totalorder (!%p192_p9), %v258_v27, 512  ;;  %s711_s7 = sshll.u32 (!%p192_p9), %s895_s22, 7 }
  0x11   : > { %v234_v13 = vld [vmem:[%s1032_s2 + $0x8] sm:$0xff] (!%p192_p9)  ;;  %v236_v14 = vld [vmem:[%s1032_s2 + $0x18] sm:$0xff] (!%p192_p9)  ;;  %v264_v31 = vsub.s32 (!%p192_p9), 1, %v963_v29  ;;  %v268_v32 = vsub.s32 (!%p192_p9), 2, %v963_v29  ;;  %v272_v36 = vsub.s32 (!%p192_p9), 3, %v963_v29  ;;  %v972_v37 = vsub.s32 (!%p192_p9), 0, %v963_v29  ;;  %s986_s12 = scalar_lea.hbm (!%p192_p9), %s1035_s5, %s711_s7 }
  0x12   : > { %425 = vrot.lane.b32.xlu0 (!%p192_p9), %v416_v2, %s839_s9  ;;  %429 = vrot.lane.b32.xlu1 (!%p192_p9), %v418_v3, %s839_s9  ;;  %s218_s8 = scalar_lea.vmem (!%p192_p9), [#allocation2], %s701_s6  ;;  %s624_s13 = scalar_lea.sflag (!%p192_p9), [#allocation3], %s216_s30 }
  0x13   : > { %s843_s14 = smov (!%p192_p9), [#allocation2]  }
  0x14   : > { %s779_s15 = sshll.u32 (!%p192_p9), %s843_s14, 4  ;;  %s780_s15 = int_to_ptr.vmem [resolvable:$false] %s779_s15 }
  0x15   : > { %s1043_s16 = smov (!%p220_p10, %s702_s16), 7 }
  0x16   : > { %441 = vrot.lane.b32.xlu0 %v439_v5, %s839_s9  ;;  %239 = vperm.xlu1 %755, %v229_v6   ;;  %s703_s17 = sshll.u32 %s1043_s16, 1  ;;  %s638_s9 = sshll.u32 %s218_s8, 4  ;;  %s988_s9 = int_to_ptr.vmem [resolvable:$true] %s638_s9 }
  0x17   : > { %s223_s26 = scalar_lea.vmem %s1030_s0, %s703_s17  ;;  %s775_s22 = scalar_lea.vmem %s988_s9, 128 }
  0x18   : > { %v226_v33 = vld [vmem:[%s223_s26] ss:$2 sm:$0xf]  ;;  %v704_v34 = vld [vmem:[%s223_s26 + $0x1] ss:$2 sm:$0xf]  ;;  %p776_p11 = scmp.ne.s32.totalorder %s988_s9, %s775_s22  ;;  %p782_p0 = scmp.lt.s32.totalorder %s988_s9, %s780_s15 }
  0x19   : > { %v265_v39 = vrot.slane %v226_v33, %v264_v31  ;;  %v318_v40 = vrot.slane %v704_v34, %v264_v31  ;;  %v269_v41 = vrot.slane %v226_v33, %v268_v32  ;;  %v273_v42 = vrot.slane %v226_v33, %v272_v36  ;;  %s781_s16 = scalar_lea.vmem %s780_s15, 256 }
  0x1a   : > { %757 = vset.pattern.permute.xlu1 %v841_v8  ;;  %244 = vperm.xlu0 %756, %v230_v7   ;;  %v261_v43 = vrot.slane %v226_v33, %v972_v37  ;;  %v322_v44 = vrot.slane %v704_v34, %v268_v32  ;;  %v326_v45 = vrot.slane %v704_v34, %v272_v36  ;;  %p777_p12 = pnand %p776_p11, %p912_p5  ;;  %p783_p1 = scmp.lt.s32.totalorder %s781_s16, %s775_s22 }
  0x1b   : > { %295 = vperm.xlu1 %757, %v229_v6   ;;  %v314_v49 = vrot.slane %v704_v34, %v972_v37 }
  0x1c   : > { %p778_p13 = pneg %p777_p12  ;;  %p784_p2 = por %p783_p1, %p782_p0 }
  0x1e   : > { %249 = vperm.xlu0 %756, %v231_v9   ;;  %p785_p3 = pnand %p784_p2, %p778_p13 }
  0x1f   : > { %299 = vperm.xlu1 %757, %v230_v7  }
  0x22   : > { %254 = vperm.xlu0 %756, %v232_v10  }
  0x23   : > { %303 = vperm.xlu1 %757, %v231_v9  }
  0x26   : > { %365 = vperm.xlu0 %756, %v233_v11  }
  0x27   : > { %307 = vperm.xlu1 %757, %v232_v10  }
  0x2a   : > { %375 = vperm.xlu0 %756, %v235_v12  }
  0x2b   : > { %758 = vset.pattern.permute.xlu1 %v840_v4 }
  0x2c   : > { %370 = vperm.xlu1 %758, %v234_v13  }
  0x30   : > { %380 = vperm.xlu1 %758, %v236_v14  }
  0x80   : > { %v424_v15 = vpop.permute.xlu0 %423  ;;  %v428_v16 = vpop.permute.xlu1 %427 }
  0x81   : > { %v435_v17 = vsub.f32 %v415_v0, %v424_v15  ;;  %v437_v18 = vsub.f32 %v417_v1, %v428_v16 }
  0x83   : > { %447 = vperm.xlu0 %756, %v435_v17  }
  0x84   : > { %v426_v19 = vpop.permute.xlu0 %425  ;;  %v430_v20 = vpop.permute.xlu1 %429 }
  0x85   : > { %v436_v21 = vsub.f32 %v416_v2, %v426_v19  ;;  %v438_v22 = vsub.f32 %v418_v3, %v430_v20 }
  0x87   : > { %457 = vperm.xlu0 %756, %v437_v18   ;;  %452 = vperm.xlu1 %758, %v436_v21  }
  0x88   : > { %v442_v23 = vpop.permute.xlu0 %441 }
  0x89   : > { %v444_v24 = vsub.f32 %v439_v5, %v442_v23 }
  0x8b   : > { %519 = vperm.xlu0 %756, %v444_v24   ;;  %462 = vperm.xlu1 %758, %v438_v22  }
  0x95   : > { %v240_v25 = vpop.permute.xlu1 %239 }
  0x96   : > { %v279_v47 = vmul.f32 %v265_v39, %v240_v25  ;;  %v280_v50 = vmul.f32 %v269_v41, %v240_v25  ;;  %v281_v52 = vmul.f32 %v273_v42, %v240_v25  ;;  %v278_v55 = vmul.f32 %v261_v43, %v240_v25 }
  0x99   : > { %v245_v28 = vpop.permute.xlu0 %244 }
  0x9a   : > { %v296_v26 = vpop.permute.xlu1 %295  ;;  %v283_v53 = vmul.f32 %v265_v39, %v245_v28  ;;  %v284_v54 = vmul.f32 %v269_v41, %v245_v28  ;;  %v285_v58 = vmul.f32 %v273_v42, %v245_v28  ;;  %v282_v59 = vmul.f32 %v261_v43, %v245_v28 }
  0x9b   : > { %v332_v48 = vmul.f32 %v318_v40, %v296_v26  ;;  %v333_v56 = vmul.f32 %v322_v44, %v296_v26  ;;  %v334_v57 = vmul.f32 %v326_v45, %v296_v26  ;;  %v331_v63 = vmul.f32 %v314_v49, %v296_v26 }
  0x9d   : > { %v250_v35 = vpop.permute.xlu0 %249  ;;  %v348_v62 = vadd.f32 %v332_v48, %v279_v47  ;;  %v349_v18 = vadd.f32 %v333_v56, %v280_v50  ;;  %v350_v19 = vadd.f32 %v334_v57, %v281_v52  ;;  %v347_v21 = vadd.f32 %v331_v63, %v278_v55 }
  0x9e   : > { %v300_v30 = vpop.permute.xlu1 %299  ;;  %v287_v60 = vmul.f32 %v265_v39, %v250_v35  ;;  %v288_v61 = vmul.f32 %v269_v41, %v250_v35  ;;  %v289_v2 = vmul.f32 %v273_v42, %v250_v35  ;;  %v286_v4 = vmul.f32 %v261_v43, %v250_v35 }
  0x9f   : > { %v336_v0 = vmul.f32 %v318_v40, %v300_v30  ;;  %v337_v1 = vmul.f32 %v322_v44, %v300_v30  ;;  %v338_v9 = vmul.f32 %v326_v45, %v300_v30  ;;  %v335_v13 = vmul.f32 %v314_v49, %v300_v30 }
  0xa1   : > { %v255_v46 = vpop.permute.xlu0 %254  ;;  %v352_v20 = vadd.f32 %v336_v0, %v283_v53  ;;  %v353_v31 = vadd.f32 %v337_v1, %v284_v54  ;;  %v354_v32 = vadd.f32 %v338_v9, %v285_v58  ;;  %v351_v30 = vadd.f32 %v335_v13, %v282_v59 }
  0xa2   : > { %v304_v38 = vpop.permute.xlu1 %303  ;;  %v291_v10 = vmul.f32 %v265_v39, %v255_v46  ;;  %v292_v11 = vmul.f32 %v269_v41, %v255_v46  ;;  %v290_v16 = vmul.f32 %v261_v43, %v255_v46  ;;  %v293_v26 = vmul.f32 %v273_v42, %v255_v46 }
  0xa3   : > { %v340_v5 = vmul.f32 %v318_v40, %v304_v38  ;;  %v341_v6 = vmul.f32 %v322_v44, %v304_v38  ;;  %v342_v7 = vmul.f32 %v326_v45, %v304_v38  ;;  %v339_v8 = vmul.f32 %v314_v49, %v304_v38 }
  0xa5   : > { %v366_v3 = vpop.permute.xlu0 %365  ;;  %v356_v22 = vadd.f32 %v340_v5, %v287_v60  ;;  %v357_v23 = vadd.f32 %v341_v6, %v288_v61  ;;  %v358_v24 = vadd.f32 %v342_v7, %v289_v2  ;;  %v355_v25 = vadd.f32 %v339_v8, %v286_v4 }
  0xa6   : > { %v308_v51 = vpop.permute.xlu1 %307  ;;  %v384_v38 = vadd.f32 %v366_v3, %v348_v62  ;;  %v385_v39 = vadd.f32 %v366_v3, %v349_v18  ;;  %v383_v43 = vadd.f32 %v366_v3, %v347_v21 }
  0xa7   : > { %v344_v14 = vmul.f32 %v318_v40, %v308_v51  ;;  %v345_v15 = vmul.f32 %v322_v44, %v308_v51  ;;  %v343_v17 = vmul.f32 %v314_v49, %v308_v51  ;;  %v346_v28 = vmul.f32 %v326_v45, %v308_v51 }
  0xa8   : > { %v386_v40 = vadd.f32 %v366_v3, %v350_v19  ;;  %v400_v56 = vmax.f32 %v384_v38, 0.0  ;;  %v401_v57 = vmax.f32 %v385_v39, 0.0  ;;  %v399_v59 = vmax.f32 %v383_v43, 0.0 }
  0xa9   : > { %v376_v33 = vpop.permute.xlu0 %375  ;;  %v360_v34 = vadd.f32 %v344_v14, %v291_v10  ;;  %v361_v35 = vadd.f32 %v345_v15, %v292_v11  ;;  %v359_v36 = vadd.f32 %v343_v17, %v290_v16  ;;  %v362_v45 = vadd.f32 %v346_v28, %v293_v26 }
  0xaa   : > { %v392_v44 = vadd.f32 %v376_v33, %v356_v22  ;;  %v393_v47 = vadd.f32 %v376_v33, %v357_v23  ;;  %v394_v48 = vadd.f32 %v376_v33, %v358_v24  ;;  %v391_v49 = vadd.f32 %v376_v33, %v355_v25 }
  0xab   : > { %v371_v12 = vpop.permute.xlu1 %370  ;;  %v402_v58 = vmax.f32 %v386_v40, 0.0 }
  0xac   : > { %v388_v50 = vadd.f32 %v371_v12, %v352_v20  ;;  %v389_v52 = vadd.f32 %v371_v12, %v353_v31  ;;  %v390_v42 = vadd.f32 %v371_v12, %v354_v32  ;;  %v387_v54 = vadd.f32 %v371_v12, %v351_v30 }
  0xad   : > { %v408_v60 = vmax.f32 %v392_v44, 0.0  ;;  %v409_v61 = vmax.f32 %v393_v47, 0.0  ;;  %v410_v62 = vmax.f32 %v394_v48, 0.0  ;;  %v407_v63 = vmax.f32 %v391_v49, 0.0 }
  0xae   : > { %v404_v0 = vmax.f32 %v388_v50, 0.0  ;;  %v405_v1 = vmax.f32 %v389_v52, 0.0  ;;  %v406_v2 = vmax.f32 %v390_v42, 0.0  ;;  %v403_v6 = vmax.f32 %v387_v54, 0.0 }
  0xaf   : > { %v381_v41 = vpop.permute.xlu1 %380 }
  0xb0   : > { %v396_v46 = vadd.f32 %v381_v41, %v360_v34  ;;  %v397_v51 = vadd.f32 %v381_v41, %v361_v35  ;;  %v395_v55 = vadd.f32 %v381_v41, %v359_v36  ;;  %v398_v3 = vadd.f32 %v381_v41, %v362_v45 }
  0xb2   : > { %v411_v7 = vmax.f32 %v395_v55, 0.0  ;;  %v412_v8 = vmax.f32 %v396_v46, 0.0  ;;  %v413_v9 = vmax.f32 %v397_v51, 0.0  ;;  %v414_v21 = vmax.f32 %v398_v3, 0.0 }
 0x102   : > { %v448_v53 = vpop.permute.xlu0 %447 }
 0x103   : > { %v466_v10 = vmul.f32 %v448_v53, %v400_v56  ;;  %v467_v11 = vmul.f32 %v448_v53, %v401_v57  ;;  %v468_v12 = vmul.f32 %v448_v53, %v402_v58  ;;  %v465_v16 = vmul.f32 %v448_v53, %v399_v59 }
 0x106   : > { %v458_v4 = vpop.permute.xlu0 %457  ;;  %v453_v5 = vpop.permute.xlu1 %452 }
 0x107   : > { %v470_v13 = vmul.f32 %v453_v5, %v404_v0  ;;  %v471_v14 = vmul.f32 %v453_v5, %v405_v1  ;;  %v472_v15 = vmul.f32 %v453_v5, %v406_v2  ;;  %v469_v17 = vmul.f32 %v453_v5, %v403_v6 }
 0x108   : > { %v474_v18 = vmul.f32 %v458_v4, %v408_v60  ;;  %v475_v19 = vmul.f32 %v458_v4, %v409_v61  ;;  %v473_v25 = vmul.f32 %v458_v4, %v407_v63  ;;  %v476_v28 = vmul.f32 %v458_v4, %v410_v62 }
 0x109   : > { %v490_v20 = vadd.f32 %v470_v13, %v466_v10  ;;  %v499_v22 = vadd.f32 %v471_v14, %v467_v11  ;;  %v508_v23 = vadd.f32 %v472_v15, %v468_v12  ;;  %v481_v26 = vadd.f32 %v469_v17, %v465_v16 }
 0x10a   : > { %v463_v24 = vpop.permute.xlu1 %462  ;;  %v520_v58 = vpop.permute.xlu0 %519 }
 0x10b   : > { %v477_v31 = vmul.f32 %v463_v24, %v411_v7  ;;  %v478_v32 = vmul.f32 %v463_v24, %v412_v8  ;;  %v479_v33 = vmul.f32 %v463_v24, %v413_v9  ;;  %v480_v34 = vmul.f32 %v463_v24, %v414_v21 }
 0x10c   : > { %v482_v35 = vadd.f32 %v481_v26, %v473_v25  ;;  %v491_v30 = vadd.f32 %v490_v20, %v474_v18  ;;  %v500_v36 = vadd.f32 %v499_v22, %v475_v19  ;;  %v509_v38 = vadd.f32 %v508_v23, %v476_v28 }
 0x10d   : > { %v525_v0 = vrot.slane %v520_v58, %v972_v37  ;;  %v842_v24 = vmov 1966171168  }
 0x10e   : > { %v483_v39 = vadd.f32 %v482_v35, %v477_v31  ;;  %v492_v40 = vadd.f32 %v491_v30, %v478_v32  ;;  %v501_v41 = vadd.f32 %v500_v36, %v479_v33  ;;  %v510_v43 = vadd.f32 %v509_v38, %v480_v34 }
 0x10f   : > { %v561_v25 = vunpack.c.l.s4 %v842_v24 }
 0x110   : > { %v484_v44 = vrot.slane %v483_v39, 4  ;;  %v493_v47 = vrot.slane %v492_v40, 4  ;;  %v502_v48 = vrot.slane %v501_v41, 4  ;;  %v511_v49 = vrot.slane %v510_v43, 4 }
 0x111   : > { %v562_v26 = vunpack.c.0.s8 %v561_v25 }
 0x112   : > { %v485_v50 = vadd.f32 %v484_v44, %v483_v39  ;;  %v494_v52 = vadd.f32 %v493_v47, %v492_v40  ;;  %v503_v42 = vadd.f32 %v502_v48, %v501_v41  ;;  %v512_v45 = vadd.f32 %v511_v49, %v510_v43 }
 0x113   : > { %v565_v31 = vsub.s32 %v562_v26, %v963_v29 }
 0x114   : > { %v486_v46 = vrot.slane %v485_v50, 2  ;;  %v495_v51 = vrot.slane %v494_v52, 2  ;;  %v504_v53 = vrot.slane %v503_v42, 2  ;;  %v513_v54 = vrot.slane %v512_v45, 2 }
 0x116   : > { %v487_v55 = vadd.f32 %v486_v46, %v485_v50  ;;  %v496_v56 = vadd.f32 %v495_v51, %v494_v52  ;;  %v505_v57 = vadd.f32 %v504_v53, %v503_v42  ;;  %v514_v59 = vadd.f32 %v513_v54, %v512_v45 }
 0x118   : > { %v488_v60 = vrot.slane %v487_v55, 1  ;;  %v497_v61 = vrot.slane %v496_v56, 1  ;;  %v506_v62 = vrot.slane %v505_v57, 1  ;;  %v515_v63 = vrot.slane %v514_v59, 1 }
 0x11a   : > { %v489_v1 = vadd.f32 %v488_v60, %v487_v55  ;;  %v498_v2 = vadd.f32 %v497_v61, %v496_v56  ;;  %v507_v3 = vadd.f32 %v506_v62, %v505_v57  ;;  %v516_v4 = vadd.f32 %v515_v63, %v514_v59 }
 0x11c   : > { %v526_v5 = vadd.f32 %v525_v0, %v489_v1  ;;  %v527_v6 = vadd.f32 %v525_v0, %v498_v2  ;;  %v528_v7 = vadd.f32 %v525_v0, %v507_v3  ;;  %v529_v8 = vadd.f32 %v525_v0, %v516_v4 }
 0x11e   : > { %v530_v9 = vsub.f32 0.0, %v526_v5  ;;  %v531_v10 = vsub.f32 0.0, %v527_v6  ;;  %v532_v11 = vsub.f32 0.0, %v528_v7  ;;  %v533_v12 = vsub.f32 0.0, %v529_v8 }
 0x120   : > { %v534_v13 = vmul.f32 1.442695, %v530_v9  ;;  %v536_v14 = vmul.f32 1.442695, %v531_v10  ;;  %v538_v15 = vmul.f32 1.442695, %v532_v11 }
 0x121   : > { %v540_v16 = vmul.f32 1.442695, %v533_v12 }
 0x122   : > { %759 = vpow2.f32 %v534_v13 }
 0x123   : > { %761 = vpow2.f32 %v536_v14 }
 0x124   : > { %763 = vpow2.f32 %v538_v15 }
 0x125   : > { %765 = vpow2.f32 %v540_v16 }
 0x12c   : > { %v760_v37 = vpop.eup %759 }
 0x12d   : > { %v762_v17 = vpop.eup %761  ;;  %v542_v18 = vadd.f32 1.0, %v760_v37 }
 0x12e   : > { %v764_v19 = vpop.eup %763  ;;  %v543_v20 = vadd.f32 1.0, %v762_v17 }
 0x12f   : > { %v766_v21 = vpop.eup %765  ;;  %v544_v22 = vadd.f32 1.0, %v764_v19  ;;  %767 = vrcp.f32 %v542_v18 }
 0x130   : > { %v545_v23 = vadd.f32 1.0, %v766_v21  ;;  %769 = vrcp.f32 %v543_v20 }
 0x131   : > { %771 = vrcp.f32 %v544_v22 }
 0x132   : > { %773 = vrcp.f32 %v545_v23 }
 0x139   : > { %v768_v28 = vpop.eup %767 }
 0x13a   : > { %v770_v32 = vpop.eup %769  ;;  %v588_v33 = vsub.f32 1.0, %v768_v28 }
 0x13b   : > { %v772_v34 = vpop.eup %771  ;;  %v558_v35 = vcombine.low %v768_v28, %v770_v32  ;;  %v589_v30 = vsub.f32 1.0, %v770_v32 }
 0x13c   : > { %v774_v36 = vpop.eup %773  ;;  %v590_v38 = vsub.f32 1.0, %v772_v34 }
 0x13d   : > { %v559_v39 = vcombine.low %v772_v34, %v774_v36  ;;  %v566_v40 = vrot.slane %v558_v35, %v565_v31  ;;  %v591_v41 = vsub.f32 1.0, %v774_v36  ;;  %v596_v43 = vcombine.low %v588_v33, %v589_v30 }
 0x13f   : > { %v573_v44 = vrot.slane %v559_v39, %v565_v31  ;;  %v597_v47 = vcombine.low %v590_v38, %v591_v41  ;;  %v604_v48 = vrot.slane %v596_v43, %v565_v31 }
 0x141   : > { %v574_v49 = vcombine.low %v566_v40, %v573_v44  ;;  %v611_v29 = vrot.slane %v597_v47, %v565_v31 }
 0x143   : > { %v581_v50 = vrot.slane %v574_v49, %v565_v31  ;;  %v612_v52 = vcombine.low %v604_v48, %v611_v29 }
 0x145   : > { %587 = vst.msk [vmem:[%s218_s8] ss:$2 sm:$0xf] %vm585_vm0, %v581_v50  ;;  %v619_v42 = vrot.slane %v612_v52, %v565_v31 }
 0x147   : > { %705 = vst.msk [vmem:[%s218_s8 + $0x1] ss:$2 sm:$0xf] %vm585_vm0, %v619_v42 }
 0x148   : > { %788 = shalt.err (!%p785_p3)
}
 0x149   : > { %s789_s17 = scalar_lea.hbm %s986_s12, 128  ;;  %s793_s26 = scalar_lea.hbm %s1035_s5, 256 }
 0x14a   : > { %p790_p4 = scmp.ne.s32.totalorder %s986_s12, %s789_s17  ;;  %p794_p9 = scmp.lt.u32.totalorder %s986_s12, %s1035_s5 }
 0x14b   : > { %p795_p10 = scmp.lt.u32.totalorder %s793_s26, %s789_s17  ;;  %p797_p12 = scmp.lt.u32.totalorder %s789_s17, %s986_s12 }
 0x14c   : > { %p791_p7 = pnand %p790_p4, %p912_p5 }
 0x14d   : > { %p796_p11 = por %p795_p10, %p794_p9 }
 0x14e   : > { %p792_p8 = pneg %p791_p7 }
 0x14f   : > { %p798_p13 = por %p797_p12, %p796_p11 }
 0x151   : > { %p799_p0 = pnand %p798_p13, %p792_p8 }
 0x153   : > { %802 = shalt.err (!%p799_p0)
}
 0x154   : > { %712 = dma.vmem_to_hbm [thread:$0]  (%p912_p5), %s988_s9, 128, %s986_s12, %s624_s13  }
 0x155 PF: > { %p718_p1 = scmp.ge.s32.totalorder %s837_s21, 2  ;;  %s650_s7 = sand.u32 1, %s825_s18  }
 0x156   : > { %s651_s8 = scalar_lea.sflag [#allocation3], %s650_s7 }
 0x157   : > { %p715_p2 = pnand %p718_p1, %p916_p6 }
 0x159   : > { %820 = dma.done.wait (!%p715_p2), %s651_s8, 128  }
 0x15a   : > { %822 = vsyncadd (!%p715_p2), %s651_s8, 4294967168  ;;  %p15_p3 = scmp.ge.s32.totalorder %s899_s24, 4   ;;  %s1038_s18 = smov %s829_s19 }
 0x15b   : > { %s1039_s19 = smov %s833_s20  ;;  %s1040_s20 = smov %s910_s27 }
 0x15c   : > { %s1041_s21 = smov %s899_s24  ;;  %17 = sbr.rel (!%p15_p3) target bundleno = 3 (0x3), region = 77 }
 0x163   :  { %656 = vsyncpa [#allocation3], 1 }
 0x164   :  { %658 = vsyncpa [#allocation3 + $0x1], 1 }

</bundles_post_ra>
